<compile_context>
chip_gen: v6e
topology: v6e:2x2x1
jax: 0.10.0
libtpu: 0.0.40
codegen_flags: <defaults>
</compile_context>

<pallas_src>
import functools
import math

import jax
import jax.numpy as jnp
from jax.experimental import pallas as pl
from jax.experimental.pallas import tpu as pltpu


# TODO(synk): `neighborhood_decoder` is an injected submodule in the PyTorch
# code (its architecture is not defined in OldMiddleDecoder). We synthesize a
# deterministic linear+tanh neighborhood decoder mapping point_features
# [N, split] -> relative_points [N*nb_neighbors, 3] and repeating `batch`.
def _fused_decoder_kernel(radius,
                          pts_ref, x_ref,
                          nw_ref, nbias_ref, aw_ref,
                          w1r_ref, w1f_ref, b1_ref, w2_ref, b2_ref,
                          out_pts_ref, out_fc2_ref):
    f32 = jnp.float32
    nw, w1r, w1f, w2 = nw_ref[...], w1r_ref[...], w1f_ref[...], w2_ref[...]

    # Activation tile cast once to the weight dtype (bf16) for the MXU;
    # accumulation and all elementwise math stay f32.
    x16 = x_ref[...].astype(nw.dtype)

    # Neighborhood decoder: rel for all nb neighbors, lane-packed (t, nb*3).
    # nw is zero-padded over the feature_features rows, so the unsplit
    # feature tile can be used directly.
    rel = jnp.tanh(jnp.dot(x16, nw, preferred_element_type=f32)
                   + nbias_ref[...])                        # f32

    # fc1: block-diagonal rel term + shared (tiled, zero-padded) feature term.
    h = jnp.maximum(
        jnp.dot(rel.astype(w1r.dtype), w1r, preferred_element_type=f32)
        + jnp.dot(x16, w1f, preferred_element_type=f32)
        + b1_ref[...], 0.0)                                 # relu(fc1), f32

    # fc2: block-diagonal weight keeps the per-neighbor chunks independent.
    y = jnp.dot(h.astype(w2.dtype), w2, preferred_element_type=f32) + b2_ref[...]
    out_fc2_ref[...] = jnp.maximum(y, 0.0)                  # relu(fc2)

    # output_points = anchor_points + relative_points * radius.
    # Anchor broadcast via pts @ [I3|I3|...] kept on the MXU in f32 (exact);
    # TODO(synk): swap for a lane-tile once unaligned minor-dim concat lowers
    # robustly — the kernel is HBM-bound, so this matmul is not on the roofline.
    out_pts_ref[...] = (
        jnp.dot(pts_ref[...], aw_ref[...], preferred_element_type=f32)
        + rel * radius)


def fold_params(params, *, nb_neighbors, split, feature_size, output_size,
                use_bf16=True):
    """One-time folding of the module weights into kernel-ready derived weights."""
    nb = nb_neighbors
    middle_size = (feature_size + output_size) // 2
    in_dim = split + feature_size
    f32 = jnp.float32
    wdt = jnp.bfloat16 if use_bf16 else f32

    eye_nb = jnp.eye(nb, dtype=f32)
    # Zero-pad so the kernel consumes the un-split `features` tile directly.
    nw_pad = jnp.zeros((in_dim, nb * 3), f32).at[:split, :].set(params["nbhd_w"])
    w1_rel_blk = jnp.kron(eye_nb, params["fc1_w"][:3, :])            # (nb*3, nb*mid)
    w1_feat = jnp.zeros((in_dim, nb * middle_size), f32).at[split:, :].set(
        jnp.tile(params["fc1_w"][3:, :], (1, nb)))                   # (in_dim, nb*mid)
    w2_blk = jnp.kron(eye_nb, params["fc2_w"])                       # (nb*mid, nb*out)
    anchor_w = jnp.tile(jnp.eye(3, dtype=f32), (1, nb))              # (3, nb*3)

    return {
        "nw": nw_pad.astype(wdt),
        "nb_bias": params["nbhd_b"].astype(f32),
        "anchor_w": anchor_w,                                        # f32: exact anchor
        "w1_rel": w1_rel_blk.astype(wdt),
        "w1_feat": w1_feat.astype(wdt),
        "b1": jnp.tile(params["fc1_b"], (1, nb)).astype(f32),
        "w2": w2_blk.astype(wdt),
        "b2": jnp.tile(params["fc2_b"], (1, nb)).astype(f32),
    }


def old_middle_decoder_forward(points, features, batch, folded, *,
                               nb_neighbors, radius, split, feature_size,
                               output_size, tile_n=4096):
    N = points.shape[0]
    assert features.shape[1] == split + feature_size
    nb = nb_neighbors
    middle_size = (feature_size + output_size) // 2
    in_dim = split + feature_size
    f32 = jnp.float32

    # Tile over points: multiple of 8, capped at tile_n, and capped at ~N/2 so
    # the "parallel" grid axis keeps both v7x TensorCores busy when N allows.
    t_cap = max(8, (tile_n // 8) * 8)
    half = max(8, ((pl.cdiv(N, 2) + 7) // 8) * 8)
    t = min(t_cap, half)
    grid = (pl.cdiv(N, t),)   # ragged last block: OOB rows are never written back

    out_pts_flat, fc2_flat = pl.pallas_call(
        functools.partial(_fused_decoder_kernel, radius),
        out_shape=(
            jax.ShapeDtypeStruct((N, nb * 3), f32),
            jax.ShapeDtypeStruct((N, nb * output_size), f32),
        ),
        grid_spec=pltpu.PrefetchScalarGridSpec(
            num_scalar_prefetch=0,
            grid=grid,
            in_specs=[
                pl.BlockSpec((t, 3), lambda i: (i, 0)),                        # points
                pl.BlockSpec((t, in_dim), lambda i: (i, 0)),                   # features (unsplit)
                pl.BlockSpec((in_dim, nb * 3), lambda i: (0, 0)),              # nbhd_w (padded)
                pl.BlockSpec((1, nb * 3), lambda i: (0, 0)),                   # nbhd_b
                pl.BlockSpec((3, nb * 3), lambda i: (0, 0)),                   # anchor broadcast
                pl.BlockSpec((nb * 3, nb * middle_size), lambda i: (0, 0)),    # w1_rel_blk
                pl.BlockSpec((in_dim, nb * middle_size), lambda i: (0, 0)),    # w1_feat (padded)
                pl.BlockSpec((1, nb * middle_size), lambda i: (0, 0)),         # b1 tiled
                pl.BlockSpec((nb * middle_size, nb * output_size), lambda i: (0, 0)),  # w2_blk
                pl.BlockSpec((1, nb * output_size), lambda i: (0, 0)),         # b2 tiled
            ],
            out_specs=[
                pl.BlockSpec((t, nb * 3), lambda i: (i, 0)),
                pl.BlockSpec((t, nb * output_size), lambda i: (i, 0)),
            ],
        ),
        compiler_params=pltpu.CompilerParams(
            dimension_semantics=("parallel",)),
    )(points, features,
      folded["nw"], folded["nb_bias"], folded["anchor_w"],
      folded["w1_rel"], folded["w1_feat"], folded["b1"],
      folded["w2"], folded["b2"])

    # Row-major-exact (copy-free) reshapes back to the module's (M, C) contract.
    output_points = out_pts_flat.reshape(N * nb, 3)
    fc2_features = fc2_flat.reshape(N * nb, output_size)
    output_batch = jnp.repeat(batch, nb, axis=0)
    return output_points, fc2_features, output_batch


def _reference(points, features, batch, params, *, nb_neighbors, radius, split,
               output_size):
    """Pure-JAX f32 reference mirroring the PyTorch forward (same synthesized
    neighborhood decoder)."""
    pf = features[:, :split]
    ff = features[:, split:]
    rel = jnp.tanh(pf @ params["nbhd_w"] + params["nbhd_b"]).reshape(-1, 3)
    ff_rep = jnp.repeat(ff, nb_neighbors, axis=0)
    cat = jnp.concatenate([rel, ff_rep], axis=1)
    h = jax.nn.relu(cat @ params["fc1_w"] + params["fc1_b"])
    y = jax.nn.relu(h @ params["fc2_w"] + params["fc2_b"])
    anchor = jnp.repeat(points, nb_neighbors, axis=0)
    return anchor + rel * radius, y, jnp.repeat(batch, nb_neighbors, axis=0)


if __name__ == "__main__":
    # Small shapes consistent with the module (N not a multiple of 8 to
    # exercise the ragged last block; grid length 2 exercises megacore path).
    nb_neighbors = 4
    radius = 0.5
    split = 8
    feature_size = 32
    output_size = 16
    N = 12  # number of input points

    middle_size = (feature_size + output_size) // 2

    key = jax.random.PRNGKey(0)
    k_pts, k_feat, k1, k2, k3, k4, k5, k6 = jax.random.split(key, 8)

    points = jax.random.normal(k_pts, (N, 3), jnp.float32)
    features = jax.random.normal(k_feat, (N, split + feature_size), jnp.float32)
    batch = jnp.zeros((N,), jnp.int32)

    def uinit(k, shape, fan_in):
        bound = 1.0 / math.sqrt(fan_in)
        return jax.random.uniform(k, shape, jnp.float32, -bound, bound)

    params = {
        "nbhd_w": uinit(k1, (split, nb_neighbors * 3), split),
        "nbhd_b": uinit(k2, (1, nb_neighbors * 3), split),
        "fc1_w": uinit(k3, (feature_size + 3, middle_size), feature_size + 3),
        "fc1_b": uinit(k4, (1, middle_size), feature_size + 3),
        "fc2_w": uinit(k5, (middle_size, output_size), middle_size),
        "fc2_b": uinit(k6, (1, output_size), middle_size),
    }

    # Weight folding hoisted out of the forward path (done once).
    folded = fold_params(params, nb_neighbors=nb_neighbors, split=split,
                         feature_size=feature_size, output_size=output_size,
                         use_bf16=True)

    forward = jax.jit(functools.partial(
        old_middle_decoder_forward,
        nb_neighbors=nb_neighbors, radius=radius, split=split,
        feature_size=feature_size, output_size=output_size))

    out_points, fc2_features, output_batch = forward(points, features, batch, folded)
    jax.block_until_ready((out_points, fc2_features, output_batch))

    ref_pts, ref_fc2, ref_batch = _reference(
        points, features, batch, params,
        nb_neighbors=nb_neighbors, radius=radius, split=split,
        output_size=output_size)

    assert out_points.shape == (N * nb_neighbors, 3)
    assert fc2_features.shape == (N * nb_neighbors, output_size)
    assert output_batch.shape == (N * nb_neighbors,)
    assert bool(jnp.all(fc2_features >= 0.0))            # ReLU output
    assert bool(jnp.all(output_batch == ref_batch))
    # bf16 MXU operands with f32 accumulation: compare at a bf16-appropriate
    # tolerance against the pure-f32 reference.
    assert bool(jnp.allclose(out_points, ref_pts, rtol=2e-2, atol=2e-2))
    assert bool(jnp.allclose(fc2_features, ref_fc2, rtol=2e-2, atol=2e-2))

    print("KERNEL_OK")
</pallas_src>

<mosaic_0001>
module attributes {stable_mosaic.version = 11 : i64} {
  func.func @_fused_decoder_kernel(%arg0: i32, %arg1: memref<8x3xf32, #tpu.memory_space<vmem>>, %arg2: memref<8x40xf32, #tpu.memory_space<vmem>>, %arg3: memref<40x12xbf16, #tpu.memory_space<vmem>>, %arg4: memref<1x12xf32, #tpu.memory_space<vmem>>, %arg5: memref<3x12xf32, #tpu.memory_space<vmem>>, %arg6: memref<12x96xbf16, #tpu.memory_space<vmem>>, %arg7: memref<40x96xbf16, #tpu.memory_space<vmem>>, %arg8: memref<1x96xf32, #tpu.memory_space<vmem>>, %arg9: memref<96x64xbf16, #tpu.memory_space<vmem>>, %arg10: memref<1x64xf32, #tpu.memory_space<vmem>>, %arg11: memref<8x12xf32, #tpu.memory_space<vmem>>, %arg12: memref<8x64xf32, #tpu.memory_space<vmem>>) attributes {dimension_semantics = [#tpu.dimension_semantics<parallel>], iteration_bounds = array<i64: 2>, scalar_prefetch = 0 : i64, scratch_operands = 0 : i64, tpu.core_type = #tpu.core_type<tc>, window_params = [{transform_indices = @transform_0, window_bounds = array<i64: 8, 3>}, {transform_indices = @transform_1, window_bounds = array<i64: 8, 40>}, {pipeline_mode = #tpu.pipeline_mode<synchronous>, transform_indices = @transform_2, window_bounds = array<i64: 40, 12>}, {pipeline_mode = #tpu.pipeline_mode<synchronous>, transform_indices = @transform_3, window_bounds = array<i64: 1, 12>}, {pipeline_mode = #tpu.pipeline_mode<synchronous>, transform_indices = @transform_4, window_bounds = array<i64: 3, 12>}, {pipeline_mode = #tpu.pipeline_mode<synchronous>, transform_indices = @transform_5, window_bounds = array<i64: 12, 96>}, {pipeline_mode = #tpu.pipeline_mode<synchronous>, transform_indices = @transform_6, window_bounds = array<i64: 40, 96>}, {pipeline_mode = #tpu.pipeline_mode<synchronous>, transform_indices = @transform_7, window_bounds = array<i64: 1, 96>}, {pipeline_mode = #tpu.pipeline_mode<synchronous>, transform_indices = @transform_8, window_bounds = array<i64: 96, 64>}, {pipeline_mode = #tpu.pipeline_mode<synchronous>, transform_indices = @transform_9, window_bounds = array<i64: 1, 64>}, {transform_indices = @transform_10, window_bounds = array<i64: 8, 12>}, {transform_indices = @transform_11, window_bounds = array<i64: 8, 64>}]} {
    %c0 = arith.constant 0 : index
    %c0_0 = arith.constant 0 : index
    %0 = vector.load %arg3[%c0, %c0_0] : memref<40x12xbf16, #tpu.memory_space<vmem>>, vector<40x12xbf16>
    %c0_1 = arith.constant 0 : index
    %c0_2 = arith.constant 0 : index
    %1 = vector.load %arg6[%c0_1, %c0_2] : memref<12x96xbf16, #tpu.memory_space<vmem>>, vector<12x96xbf16>
    %c0_3 = arith.constant 0 : index
    %c0_4 = arith.constant 0 : index
    %2 = vector.load %arg7[%c0_3, %c0_4] : memref<40x96xbf16, #tpu.memory_space<vmem>>, vector<40x96xbf16>
    %c0_5 = arith.constant 0 : index
    %c0_6 = arith.constant 0 : index
    %3 = vector.load %arg9[%c0_5, %c0_6] : memref<96x64xbf16, #tpu.memory_space<vmem>>, vector<96x64xbf16>
    %c0_7 = arith.constant 0 : index
    %c0_8 = arith.constant 0 : index
    %4 = vector.load %arg2[%c0_7, %c0_8] : memref<8x40xf32, #tpu.memory_space<vmem>>, vector<8x40xf32>
    %5 = arith.truncf %4 : vector<8x40xf32> to vector<8x40xbf16>
    %cst = arith.constant dense<0.000000e+00> : vector<8x12xf32>
    %6 = tpu.matmul %5, %0, %cst {dimension_numbers = #tpu.dot_dimension_numbers<[1], [0], [0], [1], [0, 0, 1, 1], [], []>} : vector<8x40xbf16>, vector<40x12xbf16>, vector<8x12xf32> -> vector<8x12xf32>
    %c0_9 = arith.constant 0 : index
    %c0_10 = arith.constant 0 : index
    %7 = vector.load %arg4[%c0_9, %c0_10] : memref<1x12xf32, #tpu.memory_space<vmem>>, vector<1x12xf32>
    %8 = vector.broadcast %7 : vector<1x12xf32> to vector<8x12xf32>
    %9 = arith.addf %6, %8 : vector<8x12xf32>
    %10 = math.tanh %9 : vector<8x12xf32>
    %11 = arith.truncf %10 : vector<8x12xf32> to vector<8x12xbf16>
    %cst_11 = arith.constant dense<0.000000e+00> : vector<8x96xf32>
    %12 = tpu.matmul %11, %1, %cst_11 {dimension_numbers = #tpu.dot_dimension_numbers<[1], [0], [0], [1], [0, 0, 1, 1], [], []>} : vector<8x12xbf16>, vector<12x96xbf16>, vector<8x96xf32> -> vector<8x96xf32>
    %cst_12 = arith.constant dense<0.000000e+00> : vector<8x96xf32>
    %13 = tpu.matmul %5, %2, %cst_12 {dimension_numbers = #tpu.dot_dimension_numbers<[1], [0], [0], [1], [0, 0, 1, 1], [], []>} : vector<8x40xbf16>, vector<40x96xbf16>, vector<8x96xf32> -> vector<8x96xf32>
    %14 = arith.addf %12, %13 : vector<8x96xf32>
    %c0_13 = arith.constant 0 : index
    %c0_14 = arith.constant 0 : index
    %15 = vector.load %arg8[%c0_13, %c0_14] : memref<1x96xf32, #tpu.memory_space<vmem>>, vector<1x96xf32>
    %16 = vector.broadcast %15 : vector<1x96xf32> to vector<8x96xf32>
    %17 = arith.addf %14, %16 : vector<8x96xf32>
    %cst_15 = arith.constant 0.000000e+00 : f32
    %18 = vector.broadcast %cst_15 : f32 to vector<8x96xf32>
    %19 = arith.maximumf %17, %18 : vector<8x96xf32>
    %20 = arith.truncf %19 : vector<8x96xf32> to vector<8x96xbf16>
    %cst_16 = arith.constant dense<0.000000e+00> : vector<8x64xf32>
    %21 = tpu.matmul %20, %3, %cst_16 {dimension_numbers = #tpu.dot_dimension_numbers<[1], [0], [0], [1], [0, 0, 1, 1], [], []>} : vector<8x96xbf16>, vector<96x64xbf16>, vector<8x64xf32> -> vector<8x64xf32>
    %c0_17 = arith.constant 0 : index
    %c0_18 = arith.constant 0 : index
    %22 = vector.load %arg10[%c0_17, %c0_18] : memref<1x64xf32, #tpu.memory_space<vmem>>, vector<1x64xf32>
    %23 = vector.broadcast %22 : vector<1x64xf32> to vector<8x64xf32>
    %24 = arith.addf %21, %23 : vector<8x64xf32>
    %cst_19 = arith.constant 0.000000e+00 : f32
    %25 = vector.broadcast %cst_19 : f32 to vector<8x64xf32>
    %26 = arith.maximumf %24, %25 : vector<8x64xf32>
    %c0_20 = arith.constant 0 : index
    %c0_21 = arith.constant 0 : index
    %27 = vector.load %arg12[%c0_20, %c0_21] : memref<8x64xf32, #tpu.memory_space<vmem>>, vector<8x64xf32>
    tpu.vector_store %arg12[%c0_20, %c0_21], %26 {strides = array<i32>} : memref<8x64xf32, #tpu.memory_space<vmem>>, vector<8x64xf32>,
    %c0_22 = arith.constant 0 : index
    %c0_23 = arith.constant 0 : index
    %28 = vector.load %arg1[%c0_22, %c0_23] : memref<8x3xf32, #tpu.memory_space<vmem>>, vector<8x3xf32>
    %c0_24 = arith.constant 0 : index
    %c0_25 = arith.constant 0 : index
    %29 = vector.load %arg5[%c0_24, %c0_25] : memref<3x12xf32, #tpu.memory_space<vmem>>, vector<3x12xf32>
    %cst_26 = arith.constant dense<0.000000e+00> : vector<8x12xf32>
    %30 = tpu.matmul %28, %29, %cst_26 {dimension_numbers = #tpu.dot_dimension_numbers<[1], [0], [0], [1], [0, 0, 1, 1], [], []>} : vector<8x3xf32>, vector<3x12xf32>, vector<8x12xf32> -> vector<8x12xf32>
    %cst_27 = arith.constant 5.000000e-01 : f32
    %31 = vector.broadcast %cst_27 : f32 to vector<8x12xf32>
    %32 = arith.mulf %10, %31 : vector<8x12xf32>
    %33 = arith.addf %30, %32 : vector<8x12xf32>
    %c0_28 = arith.constant 0 : index
    %c0_29 = arith.constant 0 : index
    %34 = vector.load %arg11[%c0_28, %c0_29] : memref<8x12xf32, #tpu.memory_space<vmem>>, vector<8x12xf32>
    tpu.vector_store %arg11[%c0_28, %c0_29], %33 {strides = array<i32>} : memref<8x12xf32, #tpu.memory_space<vmem>>, vector<8x12xf32>,
    return
  }
  func.func @transform_0(%arg0: i32) -> (i32, i32) {
    %c0_i32 = arith.constant 0 : i32
    %c0_i32_0 = arith.constant 0 : i32
    return %arg0, %c0_i32 : i32, i32
  }
  func.func @transform_1(%arg0: i32) -> (i32, i32) {
    %c0_i32 = arith.constant 0 : i32
    %c0_i32_0 = arith.constant 0 : i32
    return %arg0, %c0_i32 : i32, i32
  }
  func.func @transform_2(%arg0: i32) -> (i32, i32) {
    %c0_i32 = arith.constant 0 : i32
    %c0_i32_0 = arith.constant 0 : i32
    %c0_i32_1 = arith.constant 0 : i32
    return %c0_i32, %c0_i32_0 : i32, i32
  }
  func.func @transform_3(%arg0: i32) -> (i32, i32) {
    %c0_i32 = arith.constant 0 : i32
    %c0_i32_0 = arith.constant 0 : i32
    %c0_i32_1 = arith.constant 0 : i32
    return %c0_i32, %c0_i32_0 : i32, i32
  }
  func.func @transform_4(%arg0: i32) -> (i32, i32) {
    %c0_i32 = arith.constant 0 : i32
    %c0_i32_0 = arith.constant 0 : i32
    %c0_i32_1 = arith.constant 0 : i32
    return %c0_i32, %c0_i32_0 : i32, i32
  }
  func.func @transform_5(%arg0: i32) -> (i32, i32) {
    %c0_i32 = arith.constant 0 : i32
    %c0_i32_0 = arith.constant 0 : i32
    %c0_i32_1 = arith.constant 0 : i32
    return %c0_i32, %c0_i32_0 : i32, i32
  }
  func.func @transform_6(%arg0: i32) -> (i32, i32) {
    %c0_i32 = arith.constant 0 : i32
    %c0_i32_0 = arith.constant 0 : i32
    %c0_i32_1 = arith.constant 0 : i32
    return %c0_i32, %c0_i32_0 : i32, i32
  }
  func.func @transform_7(%arg0: i32) -> (i32, i32) {
    %c0_i32 = arith.constant 0 : i32
    %c0_i32_0 = arith.constant 0 : i32
    %c0_i32_1 = arith.constant 0 : i32
    return %c0_i32, %c0_i32_0 : i32, i32
  }
  func.func @transform_8(%arg0: i32) -> (i32, i32) {
    %c0_i32 = arith.constant 0 : i32
    %c0_i32_0 = arith.constant 0 : i32
    %c0_i32_1 = arith.constant 0 : i32
    return %c0_i32, %c0_i32_0 : i32, i32
  }
  func.func @transform_9(%arg0: i32) -> (i32, i32) {
    %c0_i32 = arith.constant 0 : i32
    %c0_i32_0 = arith.constant 0 : i32
    %c0_i32_1 = arith.constant 0 : i32
    return %c0_i32, %c0_i32_0 : i32, i32
  }
  func.func @transform_10(%arg0: i32) -> (i32, i32) {
    %c0_i32 = arith.constant 0 : i32
    %c0_i32_0 = arith.constant 0 : i32
    return %arg0, %c0_i32 : i32, i32
  }
  func.func @transform_11(%arg0: i32) -> (i32, i32) {
    %c0_i32 = arith.constant 0 : i32
    %c0_i32_0 = arith.constant 0 : i32
    return %arg0, %c0_i32 : i32, i32
  }
}

</mosaic_0001>

<bundles_post_ra>
// kernel: old_middle_decoder_forward.1
= control target key start
LH: loop header
LB: loop body
LE: loop exit
PB: predicated region body
PF: predicated region fallthrough
CT: control target
= control target key end

     0   :  { %s1092_s17 = smov 0   ;;  %s1202_s0 = inlined_call_operand.vmem [shape: f32[12,3], index: 0, kind: input, shape index: {}]   ;;  %s1203_s1 = inlined_call_operand.vmem [shape: f32[12,40], index: 1, kind: input, shape index: {}]   ;;  %s1204_s2 = inlined_call_operand.vmem [shape: bf16[40,12], index: 2, kind: input, shape index: {}]   ;;  %s1205_s3 = inlined_call_operand.vmem [shape: f32[1,12], index: 3, kind: input, shape index: {}]   ;;  %s1206_s4 = inlined_call_operand.vmem [shape: f32[3,12], index: 4, kind: input, shape index: {}]   ;;  %s1207_s5 = inlined_call_operand.vmem [shape: bf16[12,96], index: 5, kind: input, shape index: {}]   ;;  %s1208_s6 = inlined_call_operand.vmem [shape: bf16[40,96], index: 6, kind: input, shape index: {}]   ;;  %s1209_s7 = inlined_call_operand.vmem [shape: f32[1,96], index: 7, kind: input, shape index: {}]   ;;  %s1210_s8 = inlined_call_operand.vmem [shape: bf16[96,64], index: 8, kind: input, shape index: {}]   ;;  %s1211_s9 = inlined_call_operand.vmem [shape: f32[1,64], index: 9, kind: input, shape index: {}]   ;;  %s1212_s10 = inlined_call_operand.vmem [shape: f32[12,12], index: 10, kind: output, shape index: {0}]   ;;  %s1213_s11 = inlined_call_operand.vmem [shape: f32[12,64], index: 11, kind: output, shape index: {1}]  }
   0x1 LB: > { %s898_s18 = sadd.s32 4294967295, %s1028_s17   ;;  %p902_p0 = scmp.ge.s32.totalorder %s1028_s17, 1  ;;  %s1028_s17 = sphi %s1092_s17, %s22_s17  }
   0x2   : > { %p348_p1 = scmp.lt.s32.totalorder %s1028_s17, 3 }
   0x4   : > { %p349_p2 = pnand %p902_p0, %p348_p1 }
   0x5   : > { %p394_p3 = scmp.lt.s32.totalorder (!%p349_p2), %s898_s18, 1 }
   0x6   : > { %352 = sbr.rel (%p349_p2) target bundleno = 636 (0x27c), region = 60 }
   0xb   : > { %v1007_v0 = vld [vmem:[%s1204_s2 + $0x10] ss:$0 sps:$4 sm:$0xff]   ;;  %vm463_vm0 = vcmask 1043456   ;;  %v1030_v1 = vmov 0.0   ;;  %vm1031_vm1 = vmmov 0   ;;  %v1008_v3 = vld [vmem:[%s1204_s2 + $0x8] sm:$0xff]  }
   0xc   : > { %950 = vmatprep.subr.bf16.mxu0 %v1030_v1  ;;  %960 = vmatprep.subr.bf16.mxu1 %v1030_v1  ;;  %v465_v2 = vsel %vm463_vm0, %v1007_v0, 0  ;;  %s1215_s18 = smov (!%p394_p3, %s898_s18), 1  ;;  %v1009_v4 = vld [vmem:[%s1204_s2] sm:$0xff]   ;;  %vm459_vm2 = vcmask 326656   ;;  %v1010_v7 = vld [vmem:[%s1208_s6 + $0x10] ss:$0 sps:$4 sm:$0xff]  }
   0xd   : > { %956 = vmatprep.mubr.msk.bf16.mxu0 %vm1031_vm1, %v1030_v1  ;;  %966 = vmatprep.mubr.msk.bf16.mxu1 %vm1031_vm1, %v1030_v1  ;;  %s1117_s25 = sshll.u32 %s1215_s18, 3  ;;  %v525_v8 = vsel %vm463_vm0, %v1010_v7, 0  ;;  %v1011_v9 = vld [vmem:[%s1208_s6 + $0x8] sm:$0xff]   ;;  %v1012_v10 = vld [vmem:[%s1208_s6] sm:$0xff]   ;;  %vm576_vm3 = vcmask 1045504   ;;  %v1016_v15 = vld [vmem:[%s1210_s8 + $0x18] sm:$0xff]  }
   0xe   : > { %951 = vmatpush3.bf16.msra.mxu0 %v465_v2  ;;  %s401_s28 = scalar_lea.vmem %s1203_s1, %s1117_s25  ;;  %961 = vmatpush3.bf16.msra.mxu1 %v525_v8  ;;  %v1013_v11 = vld [vmem:[%s1207_s5] sm:$0x3f]   ;;  %v1014_v13 = vld [vmem:[%s1210_s8 + $0x28] sm:$0xff]   ;;  %v1017_v16 = vld [vmem:[%s1210_s8 + $0x10] sm:$0xff]   ;;  %vm572_vm4 = vcmask 97280   ;;  %vm727_vm5 = vcmask 1042432   ;;  %s397_s15 = scalar_lea.vmem %s1202_s0, %s1117_s25 }
   0xf   : > { %952 = vmatprep.subr.bf16.mxu0 %v1030_v1  ;;  %v435_v5 = vld [vmem:[%s401_s28] sm:$0xff]  ;;  %962 = vmatprep.subr.bf16.mxu1 %v1030_v1  ;;  %v578_v12 = vsel %vm576_vm3, %v1013_v11, 0  ;;  %vm723_vm6 = vcmask 23552   ;;  %v1018_v31 = vld [vmem:[%s1210_s8 + $0x8] sm:$0xff]   ;;  %vm673_vm7 = vcmask 785408   ;;  %s405_s26 = scalar_lea.vmem %s1212_s10, %s1117_s25  ;;  %s409_s12 = scalar_lea.vmem %s1213_s11, %s1117_s25  ;;  %vm718_vm8 = vcmask 523264  }
  0x10   : > { %v436_v6 = vpack.c.bf16 %v435_v5, %v435_v5  ;;  %v1015_v14 = vld [vmem:[%s1210_s8 + $0x20] sm:$0xff]  }
  0x11   : > { %v907_v17 = vld [vmem:[%s1205_s3] ss:$0 sm:$0xff] }
  0x12   : > { %953 = vmatpush3.bf16.msra.mxu0 %v1008_v3  ;;  %963 = vmatpush3.bf16.msra.mxu1 %v1011_v9  ;;  %v721_v25 = vld [vmem:[%s1206_s4] sm:$0x7] }
  0x13   : > { %954 = vmatprep.subr.bf16.mxu0 %v1030_v1  ;;  %964 = vmatprep.subr.bf16.mxu1 %v1030_v1  ;;  %v720_v26 = vld [vmem:[%s397_s15] sm:$0xff] }
  0x14   : > { %v1019_v32 = vld [vmem:[%s1210_s8] sm:$0xff]  }
  0x15   : > { %v918_v34 = vld [vmem:[%s1209_s7] ss:$0 sm:$0xff] }
  0x16   : > { %955 = vmatpush3.bf16.msra.mxu0 %v1009_v4  ;;  %965 = vmatpush3.bf16.msra.mxu1 %v1012_v10  ;;  %v919_v46 = vld [vmem:[%s1211_s9] ss:$0 sm:$0xff] }
  0x17   : > { %970 = vmatprep.subr.bf16.mxu0 %v1030_v1  ;;  %976 = vmatprep.subr.bf16.mxu1 %v1030_v1 }
  0x19   : > { %957 = vmatmul.mubr.msk.bf16.vlgmr.msra.gmra.mxu0 %vm459_vm2, %v436_v6  ;;  %967 = vmatmul.mubr.msk.bf16.vlgmr.msra.gmra.mxu1 %vm459_vm2, %v436_v6 }
  0x1a   : > { %972 = vmatprep.mubr.msk.bf16.mxu0 %vm1031_vm1, %v1030_v1  ;;  %971 = vmatpush3.bf16.msra.mxu0 %v578_v12 }
  0x1b   : > { %992 = vmatprep.subr.mxu0 %v1030_v1  ;;  %988 = vmatprep.mubr.msk.bf16.mxu1 %vm1031_vm1, %v1030_v1 }
  0x1c   : > { %977 = vmatpush3.bf16.msra.mxu1 %v1014_v13 }
  0x1d   : > { %978 = vmatprep.subr.bf16.mxu1 %v1030_v1 }
  0x20   : > { %979 = vmatpush3.bf16.msra.mxu1 %v1015_v14 }
  0x21   : > { %980 = vmatprep.subr.bf16.mxu1 %v1030_v1 }
  0x24   : > { %981 = vmatpush3.bf16.msra.mxu1 %v1016_v15 }
  0x25   : > { %982 = vmatprep.subr.bf16.mxu1 %v1030_v1 }
  0x28   : > { %983 = vmatpush3.bf16.msra.mxu1 %v1017_v16 }
  0x29   : > { %984 = vmatprep.subr.bf16.mxu1 %v1030_v1 }
  0x2c   : > { %985 = vmatpush3.bf16.msra.mxu1 %v1018_v31 }
  0x2d   : > { %986 = vmatprep.subr.bf16.mxu1 %v1030_v1 }
  0x30   : > { %987 = vmatpush3.bf16.msra.mxu1 %v1019_v32 }
  0xd9   : > { %v501_v18 = vpop.f32.mrf.mxu0  ;;  %v561_v27 = vpop.f32.mrf.mxu1 }
  0xda   : > { %v502_v19 = vadd.f32 %v907_v17, %v501_v18 }
  0xdb   : > { %v958_v20 = vpop.f32.mrf.mxu0  ;;  %v968_v28 = vpop.f32.mrf.mxu1 }
  0xdc   : > { %1020 = vtanh.f32 %v502_v19 }
  0xdd   : > { %v504_v21 = vpop.f32.mrf.mxu0  ;;  %v564_v29 = vpop.f32.mrf.mxu1 }
  0xdf   : > { %v959_v22 = vpop.f32.mrf.mxu0  ;;  %v969_v30 = vpop.f32.mrf.mxu1 }
  0xe9   : > { %v1021_v23 = vpop.eup %1020 }
  0xea   : > { %v508_v24 = vpack.c.bf16 %v1021_v23, %v1021_v23  ;;  %v722_v42 = vmul.f32 0.5, %v1021_v23 }
  0xec   : > { %973 = vmatmul.mubr.msk.bf16.vlgmr.msra.gmra.mxu0 %vm572_vm4, %v508_v24 }
  0xed   : > { %993 = vmatpush3.msk.msra.mxu0 %vm727_vm5, %v721_v25  ;;  %994 = vmatprep.mubr.msk.f32.mxu0 %vm1031_vm1, %v1030_v1 }
  0xf4   : > { %995 = vmatmul.mubr.msk.f32.vlgmr.msra.gmra.mxu0 %vm723_vm6, %v720_v26 }
 0x1ac   : > { %v614_v33 = vpop.f32.mrf.mxu0 }
 0x1ad   : > { %v615_v35 = vadd.f32 %v614_v33, %v561_v27 }
 0x1ae   : > { %v974_v36 = vpop.f32.mrf.mxu0 }
 0x1af   : > { %v627_v37 = vadd.f32 %v918_v34, %v615_v35 }
 0x1b0   : > { %v617_v38 = vpop.f32.mrf.mxu0 }
 0x1b1   : > { %v628_v39 = vmax.f32 %v627_v37, 0.0 }
 0x1b2   : > { %v975_v40 = vpop.f32.mrf.mxu0 }
 0x1b3   : > { %v629_v41 = vpack.c.bf16 %v628_v39, %v628_v39 }
 0x1b4   : > { %v797_v43 = vpop.f32.mrf.mxu0 }
 0x1b5   : > { %v798_v44 = vadd.f32 %v797_v43, %v722_v42  ;;  %989 = vmatmul.mubr.msk.bf16.vlgmr.msra.gmra.mxu1 %vm673_vm7, %v629_v41 }
 0x1b6   : > { %v996_v45 = vpop.f32.mrf.mxu0 }
 0x1b7   : > { %801 = vst.msk [vmem:[%s405_s26] sm:$0xff] %vm572_vm4, %v798_v44 }
 0x275   : > { %v711_v47 = vpop.f32.mrf.mxu1 }
 0x276   : > { %v712_v48 = vadd.f32 %v919_v46, %v711_v47 }
 0x277   : > { %v990_v49 = vpop.f32.mrf.mxu1 }
 0x278   : > { %v717_v50 = vmax.f32 %v712_v48, 0.0 }
 0x279   : > { %v714_v51 = vpop.f32.mrf.mxu1 }
 0x27a   : > { %719 = vst.msk [vmem:[%s409_s12] sm:$0xff] %vm718_vm8, %v717_v50 }
 0x27b   : > { %v991_v52 = vpop.f32.mrf.mxu1 }
 0x27c PF: > { %s22_s17 = sadd.s32 1, %s1028_s17  }
 0x27d   : > { %p19_p4 = scmp.ge.s32.totalorder %s22_s17, 4  }
 0x27f   :  { %21 = sbr.rel (!%p19_p4) target bundleno = 1 (0x1), region = 105 }

</bundles_post_ra>
